<compile_context>
chip_gen: v7x
topology: tpu7x:2x2x1
jax: 0.10.0
libtpu: 0.0.40
codegen_flags: <defaults>
</compile_context>

<pallas_src>
from functools import partial
from typing import List, Tuple

import jax
import jax.numpy as jnp
from jax.experimental import pallas as pl
from jax.experimental.pallas import tpu as pltpu

_GATE_LANES = 8                       # narrow gate slab; wrapper keeps lane 0
_VMEM_TILE_BUDGET = 3 * 1024 * 1024   # target bytes for one rep input tile
_MAX_ROW_TILE = 8192
_MIN_ROW_TILE = 8


def _round_up(x: int, m: int) -> int:
    return ((x + m - 1) // m) * m


def _pick_row_tile(s_pad8: int, d_model: int, itemsize: int) -> int:
    """Pick a multiple-of-8 row tile under a VMEM byte budget.

    Prefers a tile that divides the 8-padded row count (zero padding waste);
    falls back to a budget-sized tile only when the divisors are tiny (e.g.
    prime row counts), trading < one tile of padding for a small grid.
    """
    cap = (_VMEM_TILE_BUDGET // max(1, d_model * itemsize)) // 8 * 8
    cap = max(_MIN_ROW_TILE, min(_MAX_ROW_TILE, cap))
    if s_pad8 <= cap:
        return s_pad8
    q = s_pad8 // 8
    best = 8
    d = 1
    while d * d <= q:
        if q % d == 0:
            for c in (d, q // d):
                t = 8 * c
                if best < t <= cap:
                    best = t
        d += 1
    if best * 16 < cap:      # divisors pathologically small -> bounded-waste fallback
        return cap
    return best


def _parser_kernel(rep_ref, w_ref, b_ref, gated_ref, gate_ref, *,
                   inv_resolution: float, hard: bool):
    """Score + gate one [row_tile, D] tile of the rep slab.

    rep_ref:   [T, D]  VMEM   rows of the (concatenated) source reps
    w_ref:     [1, D]  VMEM   lane-dense f32 score projection (grid-resident)
    b_ref:     [1]     SMEM   scalar score bias
    gated_ref: [T, D]  VMEM   output: rep * gate
    gate_ref:  [T, 8]  VMEM   output: gate broadcast over 8 lanes (lane 0 kept)
    """
    rep = rep_ref[...]
    rep_f32 = rep.astype(jnp.float32)            # compute in f32 (v5e: no bf16 VALU)
    w = w_ref[...]                               # already f32 (cast hoisted to wrapper)
    b = b_ref[0]

    # Score_Net: VPU multiply + XLU cross-lane reduce (no degenerate MXU matvec).
    score = jnp.sum(rep_f32 * w, axis=-1, keepdims=True) + b     # [T, 1]

    if hard:
        # sigmoid(s / res) > 0.5  <=>  s > 0  (res > 0): one VPU compare,
        # no EUP sigmoid, no temperature multiply.  Tie s == 0 -> gate 0.
        gate = jnp.where(score > 0.0, 1.0, 0.0)                  # [T, 1]
    else:
        # Gate_Net: temperature-scaled sigmoid (EUP).
        gate = jax.nn.sigmoid(score * inv_resolution)            # [T, 1]

    gated_ref[...] = (rep_f32 * gate).astype(gated_ref.dtype)
    gate_ref[...] = jnp.broadcast_to(gate, gate_ref.shape).astype(gate_ref.dtype)


def _run_parser_kernel(slab: jax.Array, w_row: jax.Array, b: jax.Array, *,
                       resolution: float, hard: bool):
    """[S, D] slab -> (gated [S, D], gate [S, 1]); one pallas_call."""
    s_total, d_model = slab.shape
    out_dtype = slab.dtype
    gate_dtype = slab.dtype                      # match rep dtype (halves bytes for bf16)
    itemsize = jnp.dtype(out_dtype).itemsize

    s_pad8 = _round_up(max(s_total, _MIN_ROW_TILE), 8)           # pad to vreg sublane only
    row_tile = _pick_row_tile(s_pad8, d_model, itemsize)
    s_pad = _round_up(s_pad8, row_tile)
    padded = s_pad != s_total
    x = jnp.pad(slab, ((0, s_pad - s_total), (0, 0))) if padded else slab

    grid = (s_pad // row_tile,)
    kernel = partial(_parser_kernel, inv_resolution=1.0 / resolution, hard=hard)

    # Explicit scoped-VMEM sizing: double-buffered rep in/out tiles + gate tiles
    # + resident weight row, with headroom.  Stays within v7x's 32 MiB default.
    rep_tile_bytes = row_tile * d_model * itemsize
    gate_tile_bytes = row_tile * _GATE_LANES * jnp.dtype(gate_dtype).itemsize
    footprint = 4 * rep_tile_bytes + 2 * gate_tile_bytes + d_model * 4
    vmem_limit = int(min(max(footprint + (4 << 20), 8 << 20), 48 << 20))

    gated_pad, gate_pad = pl.pallas_call(
        kernel,
        out_shape=(
            jax.ShapeDtypeStruct((s_pad, d_model), out_dtype),
            jax.ShapeDtypeStruct((s_pad, _GATE_LANES), gate_dtype),
        ),
        grid=grid,
        in_specs=[
            pl.BlockSpec((row_tile, d_model), lambda i: (i, 0)),
            pl.BlockSpec((1, d_model), lambda i: (0, 0)),        # weight stays resident
            pl.BlockSpec(memory_space=pltpu.MemorySpace.SMEM),   # scalar bias in SMEM
        ],
        out_specs=(
            pl.BlockSpec((row_tile, d_model), lambda i: (i, 0)),
            pl.BlockSpec((row_tile, _GATE_LANES), lambda i: (i, 0)),
        ),
        compiler_params=pltpu.CompilerParams(
            dimension_semantics=("parallel",),
            vmem_limit_bytes=vmem_limit,
        ),
    )(x, w_row, b)

    gated = gated_pad[:s_total] if padded else gated_pad
    gate_col = gate_pad[:s_total, :1]
    return gated, gate_col


@partial(jax.jit, static_argnames=("resolution", "hard"))
def _parser_forward_slab(slab, w_row, b, *, resolution: float, hard: bool):
    """Zero-copy path: contiguous slab in -> (gated_slab, gate_col) out."""
    return _run_parser_kernel(slab, w_row, b, resolution=resolution, hard=hard)


@partial(jax.jit, static_argnames=("resolution", "hard"))
def _parser_forward_reps(reps: Tuple[jax.Array, ...], w_row, b, *,
                         resolution: float, hard: bool):
    """List-of-reps path (original API): concat -> kernel -> per-rep slices.

    TODO(synk): the concatenate + per-rep output slices are extra HBM copies
    around an HBM-bound kernel; callers holding a contiguous slab should use
    `Parser.forward_slab` instead.
    """
    lengths = [int(r.shape[0]) for r in reps]
    slab = reps[0] if len(reps) == 1 else jnp.concatenate(reps, axis=0)
    gated, gate = _run_parser_kernel(slab, w_row, b,
                                     resolution=resolution, hard=hard)
    outs = []
    off = 0
    for n in lengths:
        outs.append((gated[off:off + n], gate[off:off + n]))
        off += n
    return tuple(outs)


class Parser:
    """JAX/Pallas re-implementation of the PyTorch Parser module (eval mode)."""

    def __init__(self, d_model: int, dropout: float, score_type: str,
                 resolution: float, hard: bool, key: jax.Array):
        del dropout      # eval-mode: dropout is identity
        del score_type   # TODO(synk): Score_Net body not in spec; dot-product scorer implemented.
        assert resolution > 0, "resolution (gate temperature) must be positive"
        k_w, _ = jax.random.split(key)
        # Lane-dense [1, d_model] f32 score projection + scalar bias (SMEM).
        self.w = (jax.random.normal(k_w, (1, d_model), jnp.float32)
                  / jnp.sqrt(jnp.float32(d_model)))
        self.b = jnp.zeros((1,), jnp.float32)
        self.resolution = float(resolution)
        self.hard = bool(hard)

    def forward_slab(self, slab: jax.Array) -> Tuple[jax.Array, jax.Array]:
        """Contiguous [S, D] slab -> (gated [S, D], gate [S, 1]), no extra copies."""
        return _parser_forward_slab(slab, self.w, self.b,
                                    resolution=self.resolution, hard=self.hard)

    def __call__(self,
                 rep_srcs: List[jax.Array],
                 rep_idx: List[List[int]],
                 score_idx: List[List[int]]) -> List[Tuple[jax.Array, jax.Array]]:
        # TODO(synk): rep_idx / score_idx grouping semantics of the original
        # Gate_Net are not available; each selected rep is scored and gated
        # directly.  TODO(synk): hard gate is forward-only (no straight-through vjp).
        flat = []
        for group_r, group_s in zip(rep_idx, score_idx):
            del group_s
            flat.extend(group_r)
        reps = tuple(rep_srcs[r] for r in flat)
        outs = _parser_forward_reps(reps, self.w, self.b,
                                    resolution=self.resolution, hard=self.hard)
        return list(outs)


def _reference(rep, w_row, b, resolution, hard):
    score = rep.astype(jnp.float32) @ w_row.reshape(-1, 1) + b[0]
    if hard:
        gate = jnp.where(score > 0.0, 1.0, 0.0)
    else:
        gate = jax.nn.sigmoid(score / resolution)
    return rep.astype(jnp.float32) * gate, gate


if __name__ == "__main__":
    key = jax.random.PRNGKey(0)
    k_p, k_x0, k_x1, k_x2 = jax.random.split(key, 4)

    d_model = 32
    # Source representations at different granularities / lengths
    # (odd length 5 exercises the 8-row padding path).
    rep_srcs = [
        jax.random.normal(k_x0, (8, d_model), jnp.float32),
        jax.random.normal(k_x1, (16, d_model), jnp.float32),
        jax.random.normal(k_x2, (5, d_model), jnp.float32),
    ]
    rep_idx = [[0, 1], [2]]
    score_idx = [[0, 1], [2]]

    for hard in (False, True):
        parser = Parser(d_model=d_model, dropout=0.1, score_type="dot",
                        resolution=0.5, hard=hard, key=k_p)

        # Original list-of-reps API.
        outs = parser(rep_srcs, rep_idx, score_idx)
        flat_reps = [rep_srcs[r] for grp in rep_idx for r in grp]
        for (gated, gate), rep in zip(outs, flat_reps):
            jax.block_until_ready(gated)
            jax.block_until_ready(gate)
            ref_gated, ref_gate = _reference(rep, parser.w, parser.b,
                                             parser.resolution, hard)
            assert gated.shape == rep.shape, "gated shape mismatch"
            assert gate.shape == (rep.shape[0], 1), "gate shape mismatch"
            assert jnp.allclose(gated.astype(jnp.float32), ref_gated, atol=1e-5), \
                "gated mismatch"
            assert jnp.allclose(gate.astype(jnp.float32), ref_gate, atol=1e-5), \
                "gate mismatch"

        # Zero-copy slab API.
        slab = jnp.concatenate(flat_reps, axis=0)
        gated_s, gate_s = parser.forward_slab(slab)
        jax.block_until_ready(gated_s)
        jax.block_until_ready(gate_s)
        ref_gated_s, ref_gate_s = _reference(slab, parser.w, parser.b,
                                             parser.resolution, hard)
        assert gated_s.shape == slab.shape and gate_s.shape == (slab.shape[0], 1)
        assert jnp.allclose(gated_s.astype(jnp.float32), ref_gated_s, atol=1e-5)
        assert jnp.allclose(gate_s.astype(jnp.float32), ref_gate_s, atol=1e-5)

    print("KERNEL_OK")
</pallas_src>

<mosaic_0001>
module attributes {stable_mosaic.version = 11 : i64} {
  func.func @_parser_kernel(%arg0: i32, %arg1: memref<32x32xf32, #tpu.memory_space<vmem>>, %arg2: memref<1x32xf32, #tpu.memory_space<vmem>>, %arg3: memref<1xf32, #tpu.memory_space<smem>>, %arg4: memref<32x32xf32, #tpu.memory_space<vmem>>, %arg5: memref<32x8xf32, #tpu.memory_space<vmem>>) attributes {dimension_semantics = [#tpu.dimension_semantics<parallel>], iteration_bounds = array<i64: 1>, scalar_prefetch = 0 : i64, scratch_operands = 0 : i64, tpu.core_type = #tpu.core_type<tc>, window_params = [{transform_indices = @transform_0, window_bounds = array<i64: 32, 32>}, {pipeline_mode = #tpu.pipeline_mode<synchronous>, transform_indices = @transform_1, window_bounds = array<i64: 1, 32>}, {transform_indices = @transform_2, window_bounds = array<i64: 1>}, {transform_indices = @transform_3, window_bounds = array<i64: 32, 32>}, {transform_indices = @transform_4, window_bounds = array<i64: 32, 8>}]} {
    %c0 = arith.constant 0 : index
    %c0_0 = arith.constant 0 : index
    %0 = vector.load %arg1[%c0, %c0_0] : memref<32x32xf32, #tpu.memory_space<vmem>>, vector<32x32xf32>
    %c0_1 = arith.constant 0 : index
    %c0_2 = arith.constant 0 : index
    %1 = vector.load %arg2[%c0_1, %c0_2] : memref<1x32xf32, #tpu.memory_space<vmem>>, vector<1x32xf32>
    %c0_3 = arith.constant 0 : index
    %2 = memref.load %arg3[%c0_3] : memref<1xf32, #tpu.memory_space<smem>>
    %3 = vector.broadcast %1 : vector<1x32xf32> to vector<32x32xf32>
    %4 = arith.mulf %0, %3 : vector<32x32xf32>
    %cst = arith.constant dense<0.000000e+00> : vector<32xf32>
    %5 = vector.multi_reduction <add>, %4, %cst [1] : vector<32x32xf32> to vector<32xf32>
    %6 = vector.shape_cast %5 : vector<32xf32> to vector<32x1xf32>
    %7 = vector.broadcast %2 : f32 to vector<32x1xf32>
    %8 = arith.addf %6, %7 : vector<32x1xf32>
    %cst_4 = arith.constant 2.000000e+00 : f32
    %9 = vector.broadcast %cst_4 : f32 to vector<32x1xf32>
    %10 = arith.mulf %8, %9 : vector<32x1xf32>
    %11 = arith.negf %10 : vector<32x1xf32>
    %12 = math.exp %11 : vector<32x1xf32>
    %cst_5 = arith.constant 1.000000e+00 : f32
    %13 = vector.broadcast %cst_5 : f32 to vector<32x1xf32>
    %14 = arith.addf %13, %12 : vector<32x1xf32>
    %15 = arith.divf %13, %14 : vector<32x1xf32>
    %16 = vector.broadcast %15 : vector<32x1xf32> to vector<32x32xf32>
    %17 = arith.mulf %0, %16 : vector<32x32xf32>
    %c0_6 = arith.constant 0 : index
    %c0_7 = arith.constant 0 : index
    %18 = vector.load %arg4[%c0_6, %c0_7] : memref<32x32xf32, #tpu.memory_space<vmem>>, vector<32x32xf32>
    tpu.vector_store %arg4[%c0_6, %c0_7], %17 {strides = array<i32>} : memref<32x32xf32, #tpu.memory_space<vmem>>, vector<32x32xf32>,
    %19 = vector.shape_cast %15 : vector<32x1xf32> to vector<32x1xf32>
    %20 = vector.broadcast %19 : vector<32x1xf32> to vector<32x8xf32>
    %c0_8 = arith.constant 0 : index
    %c0_9 = arith.constant 0 : index
    %21 = vector.load %arg5[%c0_8, %c0_9] : memref<32x8xf32, #tpu.memory_space<vmem>>, vector<32x8xf32>
    tpu.vector_store %arg5[%c0_8, %c0_9], %20 {strides = array<i32>} : memref<32x8xf32, #tpu.memory_space<vmem>>, vector<32x8xf32>,
    return
  }
  func.func @transform_0(%arg0: i32) -> (i32, i32) {
    %c0_i32 = arith.constant 0 : i32
    %c0_i32_0 = arith.constant 0 : i32
    return %arg0, %c0_i32 : i32, i32
  }
  func.func @transform_1(%arg0: i32) -> (i32, i32) {
    %c0_i32 = arith.constant 0 : i32
    %c0_i32_0 = arith.constant 0 : i32
    %c0_i32_1 = arith.constant 0 : i32
    return %c0_i32, %c0_i32_0 : i32, i32
  }
  func.func @transform_2(%arg0: i32) -> i32 {
    %c0_i32 = arith.constant 0 : i32
    %c0_i32_0 = arith.constant 0 : i32
    return %c0_i32 : i32
  }
  func.func @transform_3(%arg0: i32) -> (i32, i32) {
    %c0_i32 = arith.constant 0 : i32
    %c0_i32_0 = arith.constant 0 : i32
    return %arg0, %c0_i32 : i32, i32
  }
  func.func @transform_4(%arg0: i32) -> (i32, i32) {
    %c0_i32 = arith.constant 0 : i32
    %c0_i32_0 = arith.constant 0 : i32
    return %arg0, %c0_i32 : i32, i32
  }
}

</mosaic_0001>

<bundles_post_ra>
// kernel: _parser_forward_reps.1
= control target key start
LH: loop header
LB: loop body
LE: loop exit
PB: predicated region body
PF: predicated region fallthrough
CT: control target
= control target key end

     0   :  { %vm33_vm0 = vcmask 261120   ;;  %vm87_vm1 = vcmask 64512   ;;  %s196_s0 = inlined_call_operand.vmem [shape: f32[32,32], index: 0, kind: input, shape index: {}]   ;;  %s197_s1 = inlined_call_operand.vmem [shape: f32[1,32], index: 1, kind: input, shape index: {}]   ;;  %s198_s2 = inlined_call_operand.<no memory space> [shape: f32[1], index: 2, kind: input, shape index: {}]   ;;  %s199_s4 = inlined_call_operand.vmem [shape: f32[32,8], index: 4, kind: output, shape index: {1}]   ;;  %s200_s3 = inlined_call_operand.vmem [shape: f32[32,32], index: 3, kind: output, shape index: {0}]  }
   0x1   :  { %v19_v0 = vld [vmem:[%s196_s0 + $0x10] sm:$0xff]  ;;  %v100_v1 = vld [vmem:[%s197_s1] ss:$0 sm:$0xff]  ;;  %v20_v5 = vld [vmem:[%s196_s0 + $0x18] sm:$0xff]  ;;  %v46_v13 = vstv %s198_s2 }
   0x2   :  { %v17_v2 = vld [vmem:[%s196_s0] sm:$0xff]  ;;  %v31_v3 = vmul.f32 %v100_v1, %v19_v0  ;;  %v18_v6 = vld [vmem:[%s196_s0 + $0x8] sm:$0xff]  ;;  %v32_v7 = vmul.f32 %v100_v1, %v20_v5 }
   0x3   :  { %v29_v4 = vmul.f32 %v100_v1, %v17_v2  ;;  %v30_v8 = vmul.f32 %v100_v1, %v18_v6 }
   0x4   :  { %v40_v9 = vsel %vm33_vm0, %v31_v3, 0.0  ;;  %v43_v11 = vsel %vm33_vm0, %v32_v7, 0.0 }
   0x5   :  { %v34_v10 = vsel %vm33_vm0, %v29_v4, 0.0  ;;  %41 = vadd.xlane.f32.xlu1 %v40_v9  ;;  %v37_v12 = vsel %vm33_vm0, %v30_v8, 0.0 }
   0x6   :  { %35 = vadd.xlane.f32.xlu0 %v34_v10 }
   0x9   :  { %44 = vadd.xlane.f32.xlu1 %v43_v11 }
   0xa   :  { %38 = vadd.xlane.f32.xlu0 %v37_v12 }
  0x92   :  { %v42_v14 = vpop.xlane.xlu1 %41 }
  0x93   :  { %v36_v15 = vpop.xlane.xlu0 %35  ;;  %v49_v16 = vadd.f32 %v46_v13, %v42_v14 }
  0x94   :  { %v47_v17 = vadd.f32 %v46_v13, %v36_v15 }
  0x95   :  { %v103_v18 = vmul.f32 -2.0, %v49_v16 }
  0x96   :  { %v101_v19 = vmul.f32 -2.0, %v47_v17  ;;  %v45_v20 = vpop.xlane.xlu1 %44 }
  0x97   :  { %v39_v21 = vpop.xlane.xlu0 %38  ;;  %v63_v22 = vmul.f32 1.442695, %v103_v18  ;;  %v50_v24 = vadd.f32 %v46_v13, %v45_v20 }
  0x98   :  { %v59_v23 = vmul.f32 1.442695, %v101_v19  ;;  %v48_v25 = vadd.f32 %v46_v13, %v39_v21 }
  0x99   :  { %105 = vpow2.f32 %v63_v22  ;;  %v104_v26 = vmul.f32 -2.0, %v50_v24 }
  0x9a   :  { %v102_v27 = vmul.f32 -2.0, %v48_v25  ;;  %107 = vpow2.f32 %v59_v23 }
  0x9b   :  { %v65_v28 = vmul.f32 1.442695, %v104_v26 }
  0x9c   :  { %v61_v29 = vmul.f32 1.442695, %v102_v27 }
  0x9d   :  { %109 = vpow2.f32 %v65_v28 }
  0x9e   :  { %111 = vpow2.f32 %v61_v29 }
  0xa3   :  { %v106_v30 = vpop.eup %105 }
  0xa4   :  { %v108_v31 = vpop.eup %107  ;;  %v69_v32 = vadd.f32 1.0, %v106_v30 }
  0xa5   :  { %v67_v33 = vadd.f32 1.0, %v108_v31 }
  0xa6   :  { %113 = vrcp.f32 %v69_v32 }
  0xa7   :  { %v110_v34 = vpop.eup %109  ;;  %115 = vrcp.f32 %v67_v33 }
  0xa8   :  { %v112_v35 = vpop.eup %111  ;;  %v70_v36 = vadd.f32 1.0, %v110_v34 }
  0xa9   :  { %v68_v37 = vadd.f32 1.0, %v112_v35 }
  0xaa   :  { %117 = vrcp.f32 %v70_v36 }
  0xab   :  { %119 = vrcp.f32 %v68_v37 }
  0xb0   :  { %v114_v38 = vpop.eup %113 }
  0xb1   :  { %v116_v39 = vpop.eup %115  ;;  %v81_v40 = vmul.f32 %v114_v38, %v19_v0  ;;  %90 = vst.msk [vmem:[%s199_s4 + $0x10] sm:$0xff] %vm87_vm1, %v114_v38 }
  0xb2   :  { %v79_v41 = vmul.f32 %v116_v39, %v17_v2  ;;  %88 = vst.msk [vmem:[%s199_s4] sm:$0xff] %vm87_vm1, %v116_v39 }
  0xb3   :  { %85 = vst.msk [vmem:[%s200_s3 + $0x10] sm:$0xff] %vm33_vm0, %v81_v40 }
  0xb4   :  { %v118_v42 = vpop.eup %117  ;;  %83 = vst.msk [vmem:[%s200_s3] sm:$0xff] %vm33_vm0, %v79_v41 }
  0xb5   :  { %v120_v43 = vpop.eup %119  ;;  %v82_v44 = vmul.f32 %v118_v42, %v20_v5  ;;  %91 = vst.msk [vmem:[%s199_s4 + $0x18] sm:$0xff] %vm87_vm1, %v118_v42 }
  0xb6   :  { %v80_v45 = vmul.f32 %v120_v43, %v18_v6  ;;  %89 = vst.msk [vmem:[%s199_s4 + $0x8] sm:$0xff] %vm87_vm1, %v120_v43 }
  0xb7   :  { %86 = vst.msk [vmem:[%s200_s3 + $0x18] sm:$0xff] %vm33_vm0, %v82_v44 }
  0xb8   :  { %84 = vst.msk [vmem:[%s200_s3 + $0x8] sm:$0xff] %vm33_vm0, %v80_v45 }

</bundles_post_ra>
